<compile_context>
chip_gen: v7x
topology: tpu7x:2x2x1
jax: 0.10.0
libtpu: 0.0.40
codegen_flags: <defaults>
</compile_context>

<pallas_src>
import functools

import jax
import jax.numpy as jnp
from jax.experimental import pallas as pl
from jax.experimental.pallas import tpu as pltpu

LEAK = 0.2
EPS = 1e-5
VMEM_LIMIT = 48 * 1024 * 1024  # safe on v5e/v6e (128 MiB) and v7x (64 MiB / TC)


def _leaky_relu(x):
    return jnp.where(x > 0, x, LEAK * x)


def _pick_batch_tile(batch, per_item_bytes, budget_bytes=4 << 20):
    """Largest divisor of `batch` that fits the VMEM budget while keeping the grid
    at >= 2 steps when possible (so both v7x TensorCores get work)."""
    divisors = [d for d in range(1, batch + 1) if batch % d == 0]
    fitting = [d for d in divisors if d * per_item_bytes <= budget_bytes] or [1]
    balanced = [d for d in fitting if batch // d >= 2]
    return max(balanced) if balanced else max(fitting)


# ---------------------------------------------------------------------------
# Kernel B: fused Conv1d(C_in->64,k4,s2,p1) + LeakyReLU + Conv1d(64->128,k4,s2,p1)
#   plus per-batch partial BatchNorm sums.  One grid step handles `bt` batch items.
#   Input is the once-padded channels-last x in quad layout (R, 4*C_in).
#   conv1 is emitted pair-packed: p[m] = [y1[2m-1] | y1[2m]]  (128 lanes, no zero pad),
#   conv2 is then z[j] = p[j] @ W_lo + p[j+1] @ W_hi + b2.
# ---------------------------------------------------------------------------
def conv_stack_kernel(xq_ref, v1_ref, v0_ref, b1_ref, pmask_ref, wlo_ref, whi_ref,
                      b2_ref, z_ref, s1_ref, s2_ref, *, bt, l2):
    m2 = l2 + 1
    v1 = v1_ref[...]
    v0 = v0_ref[...]
    b1 = b1_ref[...]
    pmask = pmask_ref[...]
    wlo = wlo_ref[...]
    whi = whi_ref[...]
    b2 = b2_ref[...]
    for i in range(bt):
        xq = xq_ref[i]                                                  # (R, 4*C_in) bf16
        # conv1 (pair-packed): contribution of quad m-1 and quad m
        s_prev = jnp.dot(xq, v1, preferred_element_type=jnp.float32)    # (R, 128)
        s_cur = jnp.dot(xq, v0, preferred_element_type=jnp.float32)     # (R, 128)
        p = _leaky_relu(s_prev[0:m2] + s_cur[1:m2 + 1] + b1) * pmask    # zero phantom halves
        p = p.astype(jnp.bfloat16)                                      # (L2+1, 128)
        # conv2
        g = jnp.dot(p, wlo, preferred_element_type=jnp.float32)         # taps 0,1
        h = jnp.dot(p, whi, preferred_element_type=jnp.float32)         # taps 2,3
        z = g[0:l2] + h[1:l2 + 1] + b2                                  # (L2, 128) f32 pre-BN
        z_ref[i] = z.astype(z_ref.dtype)
        s1_ref[i] = jnp.sum(z, axis=0, keepdims=True)                   # partial BN sums
        s2_ref[i] = jnp.sum(z * z, axis=0, keepdims=True)


# ---------------------------------------------------------------------------
# Kernel C: batch-stat reduction (folded in-kernel) + BatchNorm + LeakyReLU +
#   AdaptiveAvgPool1d(1) (mean over length) + 1x1 conv (128->1) on the VPU + sigmoid.
# ---------------------------------------------------------------------------
def finalize_kernel(z_ref, s1_ref, s2_ref, g_ref, beta_ref, wf_ref, bf_ref, o_ref,
                    *, bt, inv_n):
    mu = jnp.sum(s1_ref[...], axis=0) * inv_n                           # (1, 128)
    var = jnp.maximum(jnp.sum(s2_ref[...], axis=0) * inv_n - mu * mu, 0.0)
    scale = g_ref[...] * jax.lax.rsqrt(var + EPS)
    shift = beta_ref[...] - mu * scale
    wf = wf_ref[...]
    bf = bf_ref[...]
    for i in range(bt):
        h = _leaky_relu(z_ref[i].astype(jnp.float32) * scale + shift)   # (L2, 128)
        pooled = jnp.mean(h, axis=0, keepdims=True)                     # (1, 128)
        logit = jnp.sum(pooled * wf, axis=1, keepdims=True) + bf        # (1, 1)
        o_ref[i] = jax.nn.sigmoid(logit)


# ---------------- parameters (matmul / im2col weight layout) ----------------

def init_params(key, input_channels):
    ks = jax.random.split(key, 6)
    scale = 0.1
    # w1[(t*C_in + c), o] == torch conv1.weight[o, c, t]
    # w2[(t*64   + c), o] == torch conv2.weight[o, c, t]
    return dict(
        w1=scale * jax.random.normal(ks[0], (4 * input_channels, 64), jnp.float32),
        b1=scale * jax.random.normal(ks[1], (1, 64), jnp.float32),
        w2=scale * jax.random.normal(ks[2], (4 * 64, 128), jnp.float32),
        b2=scale * jax.random.normal(ks[3], (1, 128), jnp.float32),
        gamma=jnp.ones((1, 128), jnp.float32),   # BatchNorm1d affine weight
        beta=jnp.zeros((1, 128), jnp.float32),   # BatchNorm1d affine bias
        wf=scale * jax.random.normal(ks[4], (1, 128), jnp.float32),
        bf=scale * jax.random.normal(ks[5], (1, 1), jnp.float32),
    )


@jax.jit
def discriminator_forward(x, params):
    # x: (B, C_in, L)  (PyTorch NCL layout)
    B, C_in, L = x.shape
    if L % 4 != 0 or L < 4:
        # TODO(synk): generalize the quad/pair packing to lengths not divisible by 4.
        raise ValueError("this Pallas port assumes the sequence length is a multiple of 4")
    L2 = L // 4            # conv2 output length
    M2 = L2 + 1            # pair-packed conv1 activation rows
    R = L2 + 2             # quad rows of the padded input (incl. leading zero quad)
    C = C_in
    Kq = 4 * C_in

    # ---- input: channels-last, once-padded, quad-packed (fused im2col) ----
    xc = jnp.transpose(x, (0, 2, 1)).astype(jnp.bfloat16)               # (B, L, C_in)
    # 4 zeros = leading "quad -1", 1 zero conv pad, data, 1 zero conv pad, 2 align zeros
    xq = jnp.pad(xc, ((0, 0), (5, 3), (0, 0))).reshape(B, R, Kq)

    # ---- conv1 weights mapped onto quad -> pair layout ----
    w1 = params["w1"]                                                   # (4*C_in, 64)
    v0 = jnp.zeros((Kq, 128), jnp.float32)
    v0 = v0.at[:, 64:128].set(w1)                                       # quad m, taps 0..3 -> y1[2m]
    v0 = v0.at[0:2 * C, 0:64].set(w1[2 * C:4 * C])                      # quad m, taps 2,3 -> y1[2m-1]
    v1 = jnp.zeros((Kq, 128), jnp.float32)
    v1 = v1.at[2 * C:4 * C, 0:64].set(w1[0:2 * C])                      # quad m-1, taps 0,1 -> y1[2m-1]
    v0 = v0.astype(jnp.bfloat16)
    v1 = v1.astype(jnp.bfloat16)
    b1p = jnp.tile(params["b1"], (1, 2))                                # (1, 128) f32

    # mask that zeroes the two "phantom" half-rows (conv2's zero padding positions)
    pmask = jnp.ones((M2, 128), jnp.float32)
    pmask = pmask.at[0, 0:64].set(0.0)
    pmask = pmask.at[M2 - 1, 64:128].set(0.0)

    # ---- conv2 weights in pair layout (no channel zero padding) ----
    w2 = params["w2"].reshape(4, 64, 128)                               # [tap, in_c, out_c]
    w_lo = w2[0:2].reshape(128, 128).astype(jnp.bfloat16)               # taps 0,1
    w_hi = w2[2:4].reshape(128, 128).astype(jnp.bfloat16)               # taps 2,3

    per_item = 4 * (R * Kq + 2 * L2 * 128 + 2 * 128)                    # rough per-batch block bytes
    bt = _pick_batch_tile(B, per_item)
    grid = (B // bt,)
    cparams = pltpu.CompilerParams(dimension_semantics=("parallel",),
                                   vmem_limit_bytes=VMEM_LIMIT)

    # ---------------- pass 1: fused conv1+conv2 + partial BN sums ----------------
    kernel_b = functools.partial(conv_stack_kernel, bt=bt, l2=L2)
    z, s1, s2 = pl.pallas_call(
        kernel_b,
        grid=grid,
        in_specs=[
            pl.BlockSpec((bt, R, Kq), lambda b: (b, 0, 0)),
            pl.BlockSpec((Kq, 128), lambda b: (0, 0)),
            pl.BlockSpec((Kq, 128), lambda b: (0, 0)),
            pl.BlockSpec((1, 128), lambda b: (0, 0)),
            pl.BlockSpec((M2, 128), lambda b: (0, 0)),
            pl.BlockSpec((128, 128), lambda b: (0, 0)),
            pl.BlockSpec((128, 128), lambda b: (0, 0)),
            pl.BlockSpec((1, 128), lambda b: (0, 0)),
        ],
        out_specs=(
            pl.BlockSpec((bt, L2, 128), lambda b: (b, 0, 0)),
            pl.BlockSpec((bt, 1, 128), lambda b: (b, 0, 0)),
            pl.BlockSpec((bt, 1, 128), lambda b: (b, 0, 0)),
        ),
        out_shape=(
            jax.ShapeDtypeStruct((B, L2, 128), jnp.bfloat16),
            jax.ShapeDtypeStruct((B, 1, 128), jnp.float32),
            jax.ShapeDtypeStruct((B, 1, 128), jnp.float32),
        ),
        compiler_params=cparams,
    )(xq, v1, v0, b1p, pmask, w_lo, w_hi, params["b2"])

    # ---------------- pass 2: BN (stats reduced in-kernel) + pool + head ----------------
    kernel_c = functools.partial(finalize_kernel, bt=bt, inv_n=1.0 / float(B * L2))
    out = pl.pallas_call(
        kernel_c,
        grid=grid,
        in_specs=[
            pl.BlockSpec((bt, L2, 128), lambda b: (b, 0, 0)),
            pl.BlockSpec((B, 1, 128), lambda b: (0, 0, 0)),
            pl.BlockSpec((B, 1, 128), lambda b: (0, 0, 0)),
            pl.BlockSpec((1, 128), lambda b: (0, 0)),
            pl.BlockSpec((1, 128), lambda b: (0, 0)),
            pl.BlockSpec((1, 128), lambda b: (0, 0)),
            pl.BlockSpec((1, 1), lambda b: (0, 0)),
        ],
        out_specs=pl.BlockSpec((bt, 1, 1), lambda b: (b, 0, 0)),
        out_shape=jax.ShapeDtypeStruct((B, 1, 1), jnp.float32),
        compiler_params=cparams,
    )(z, s1, s2, params["gamma"], params["beta"], params["wf"], params["bf"])

    return out.reshape(B, 1)                                            # matches x.view(B, -1)


# ---------------- pure-JAX f32 reference (training-mode BatchNorm) ----------------

def _im2col_1d(x, k=4, s=2, p=1):
    B, L, C = x.shape
    xp = jnp.pad(x, ((0, 0), (p, p), (0, 0)))
    Lout = (L + 2 * p - k) // s + 1
    idx = jnp.arange(Lout)[:, None] * s + jnp.arange(k)[None, :]
    patches = xp[:, idx, :]                                             # (B, Lout, k, C)
    return patches.reshape(B * Lout, k * C), Lout


def reference_forward(x, params):
    B = x.shape[0]
    xc = jnp.transpose(x, (0, 2, 1))
    p1, L1 = _im2col_1d(xc)
    y1 = _leaky_relu(p1 @ params["w1"] + params["b1"]).reshape(B, L1, 64)
    p2, L2 = _im2col_1d(y1)
    z = p2 @ params["w2"] + params["b2"]
    mu = z.mean(0, keepdims=True)
    var = ((z - mu) ** 2).mean(0, keepdims=True)
    h = _leaky_relu(params["gamma"] * (z - mu) / jnp.sqrt(var + EPS) + params["beta"])
    pooled = h.reshape(B, L2, 128).mean(axis=1)
    return jax.nn.sigmoid(pooled @ params["wf"].T + params["bf"])


if __name__ == "__main__":
    key = jax.random.PRNGKey(0)
    kx, kp = jax.random.split(key)
    B, C_in, L = 2, 4, 16
    x = jax.random.normal(kx, (B, C_in, L), jnp.float32)
    params = init_params(kp, C_in)

    out = discriminator_forward(x, params)
    jax.block_until_ready(out)

    ref = reference_forward(x, params)
    assert out.shape == (B, 1), out.shape
    # bf16 MXU path -> loosened tolerance vs. the f32 reference
    assert jnp.allclose(out, ref, atol=2e-2, rtol=2e-2), (out, ref)
    print("KERNEL_OK")
</pallas_src>

<mosaic_0001>
module attributes {stable_mosaic.version = 11 : i64} {
  func.func @conv_stack_kernel(%arg0: i32, %arg1: memref<1x6x16xbf16, #tpu.memory_space<vmem>>, %arg2: memref<16x128xbf16, #tpu.memory_space<vmem>>, %arg3: memref<16x128xbf16, #tpu.memory_space<vmem>>, %arg4: memref<1x128xf32, #tpu.memory_space<vmem>>, %arg5: memref<5x128xf32, #tpu.memory_space<vmem>>, %arg6: memref<128x128xbf16, #tpu.memory_space<vmem>>, %arg7: memref<128x128xbf16, #tpu.memory_space<vmem>>, %arg8: memref<1x128xf32, #tpu.memory_space<vmem>>, %arg9: memref<1x4x128xbf16, #tpu.memory_space<vmem>>, %arg10: memref<1x1x128xf32, #tpu.memory_space<vmem>>, %arg11: memref<1x1x128xf32, #tpu.memory_space<vmem>>) attributes {dimension_semantics = [#tpu.dimension_semantics<parallel>], iteration_bounds = array<i64: 2>, scalar_prefetch = 0 : i64, scratch_operands = 0 : i64, tpu.core_type = #tpu.core_type<tc>, window_params = [{transform_indices = @transform_0, window_bounds = array<i64: 1, 6, 16>}, {pipeline_mode = #tpu.pipeline_mode<synchronous>, transform_indices = @transform_1, window_bounds = array<i64: 16, 128>}, {pipeline_mode = #tpu.pipeline_mode<synchronous>, transform_indices = @transform_2, window_bounds = array<i64: 16, 128>}, {pipeline_mode = #tpu.pipeline_mode<synchronous>, transform_indices = @transform_3, window_bounds = array<i64: 1, 128>}, {pipeline_mode = #tpu.pipeline_mode<synchronous>, transform_indices = @transform_4, window_bounds = array<i64: 5, 128>}, {pipeline_mode = #tpu.pipeline_mode<synchronous>, transform_indices = @transform_5, window_bounds = array<i64: 128, 128>}, {pipeline_mode = #tpu.pipeline_mode<synchronous>, transform_indices = @transform_6, window_bounds = array<i64: 128, 128>}, {pipeline_mode = #tpu.pipeline_mode<synchronous>, transform_indices = @transform_7, window_bounds = array<i64: 1, 128>}, {transform_indices = @transform_8, window_bounds = array<i64: 1, 4, 128>}, {transform_indices = @transform_9, window_bounds = array<i64: 1, 1, 128>}, {transform_indices = @transform_10, window_bounds = array<i64: 1, 1, 128>}]} {
    %c0 = arith.constant 0 : index
    %c0_0 = arith.constant 0 : index
    %0 = vector.load %arg2[%c0, %c0_0] : memref<16x128xbf16, #tpu.memory_space<vmem>>, vector<16x128xbf16>
    %c0_1 = arith.constant 0 : index
    %c0_2 = arith.constant 0 : index
    %1 = vector.load %arg3[%c0_1, %c0_2] : memref<16x128xbf16, #tpu.memory_space<vmem>>, vector<16x128xbf16>
    %c0_3 = arith.constant 0 : index
    %c0_4 = arith.constant 0 : index
    %2 = vector.load %arg4[%c0_3, %c0_4] : memref<1x128xf32, #tpu.memory_space<vmem>>, vector<1x128xf32>
    %c0_5 = arith.constant 0 : index
    %c0_6 = arith.constant 0 : index
    %3 = vector.load %arg5[%c0_5, %c0_6] : memref<5x128xf32, #tpu.memory_space<vmem>>, vector<5x128xf32>
    %c0_7 = arith.constant 0 : index
    %c0_8 = arith.constant 0 : index
    %4 = vector.load %arg6[%c0_7, %c0_8] : memref<128x128xbf16, #tpu.memory_space<vmem>>, vector<128x128xbf16>
    %c0_9 = arith.constant 0 : index
    %c0_10 = arith.constant 0 : index
    %5 = vector.load %arg7[%c0_9, %c0_10] : memref<128x128xbf16, #tpu.memory_space<vmem>>, vector<128x128xbf16>
    %c0_11 = arith.constant 0 : index
    %c0_12 = arith.constant 0 : index
    %6 = vector.load %arg8[%c0_11, %c0_12] : memref<1x128xf32, #tpu.memory_space<vmem>>, vector<1x128xf32>
    %c0_13 = arith.constant 0 : index
    %c0_14 = arith.constant 0 : index
    %c0_15 = arith.constant 0 : index
    %7 = vector.load %arg1[%c0_13, %c0_14, %c0_15] : memref<1x6x16xbf16, #tpu.memory_space<vmem>>, vector<1x6x16xbf16>
    %8 = vector.shape_cast %7 : vector<1x6x16xbf16> to vector<6x16xbf16>
    %cst = arith.constant dense<0.000000e+00> : vector<6x128xf32>
    %9 = tpu.matmul %8, %0, %cst {dimension_numbers = #tpu.dot_dimension_numbers<[1], [0], [0], [1], [0, 0, 1, 1], [], []>} : vector<6x16xbf16>, vector<16x128xbf16>, vector<6x128xf32> -> vector<6x128xf32>
    %cst_16 = arith.constant dense<0.000000e+00> : vector<6x128xf32>
    %10 = tpu.matmul %8, %1, %cst_16 {dimension_numbers = #tpu.dot_dimension_numbers<[1], [0], [0], [1], [0, 0, 1, 1], [], []>} : vector<6x16xbf16>, vector<16x128xbf16>, vector<6x128xf32> -> vector<6x128xf32>
    %11 = vector.extract_strided_slice %9 {offsets = [0, 0], sizes = [5, 128], strides = [1, 1]} : vector<6x128xf32> to vector<5x128xf32>
    %12 = vector.extract_strided_slice %10 {offsets = [1, 0], sizes = [5, 128], strides = [1, 1]} : vector<6x128xf32> to vector<5x128xf32>
    %13 = arith.addf %11, %12 : vector<5x128xf32>
    %14 = vector.broadcast %2 : vector<1x128xf32> to vector<5x128xf32>
    %15 = arith.addf %13, %14 : vector<5x128xf32>
    %cst_17 = arith.constant 0.000000e+00 : f32
    %16 = vector.broadcast %cst_17 : f32 to vector<5x128xf32>
    %17 = arith.cmpf ogt, %15, %16 : vector<5x128xf32>
    %cst_18 = arith.constant 2.000000e-01 : f32
    %18 = vector.broadcast %cst_18 : f32 to vector<5x128xf32>
    %19 = arith.mulf %18, %15 : vector<5x128xf32>
    %20 = arith.select %17, %15, %19 : vector<5x128xi1>, vector<5x128xf32>
    %21 = arith.mulf %20, %3 : vector<5x128xf32>
    %22 = arith.truncf %21 : vector<5x128xf32> to vector<5x128xbf16>
    %cst_19 = arith.constant dense<0.000000e+00> : vector<5x128xf32>
    %23 = tpu.matmul %22, %4, %cst_19 {dimension_numbers = #tpu.dot_dimension_numbers<[1], [0], [0], [1], [0, 0, 1, 1], [], []>} : vector<5x128xbf16>, vector<128x128xbf16>, vector<5x128xf32> -> vector<5x128xf32>
    %cst_20 = arith.constant dense<0.000000e+00> : vector<5x128xf32>
    %24 = tpu.matmul %22, %5, %cst_20 {dimension_numbers = #tpu.dot_dimension_numbers<[1], [0], [0], [1], [0, 0, 1, 1], [], []>} : vector<5x128xbf16>, vector<128x128xbf16>, vector<5x128xf32> -> vector<5x128xf32>
    %25 = vector.extract_strided_slice %23 {offsets = [0, 0], sizes = [4, 128], strides = [1, 1]} : vector<5x128xf32> to vector<4x128xf32>
    %26 = vector.extract_strided_slice %24 {offsets = [1, 0], sizes = [4, 128], strides = [1, 1]} : vector<5x128xf32> to vector<4x128xf32>
    %27 = arith.addf %25, %26 : vector<4x128xf32>
    %28 = vector.broadcast %6 : vector<1x128xf32> to vector<4x128xf32>
    %29 = arith.addf %27, %28 : vector<4x128xf32>
    %30 = arith.truncf %29 : vector<4x128xf32> to vector<4x128xbf16>
    %c0_21 = arith.constant 0 : index
    %c0_22 = arith.constant 0 : index
    %c0_23 = arith.constant 0 : index
    %31 = vector.load %arg9[%c0_21, %c0_22, %c0_23] : memref<1x4x128xbf16, #tpu.memory_space<vmem>>, vector<1x4x128xbf16>
    %32 = vector.shape_cast %31 : vector<1x4x128xbf16> to vector<4x128xbf16>
    %33 = vector.shape_cast %30 : vector<4x128xbf16> to vector<1x4x128xbf16>
    tpu.vector_store %arg9[%c0_21, %c0_22, %c0_23], %33 {strides = array<i32>} : memref<1x4x128xbf16, #tpu.memory_space<vmem>>, vector<1x4x128xbf16>,
    %cst_24 = arith.constant dense<0.000000e+00> : vector<128xf32>
    %34 = vector.multi_reduction <add>, %29, %cst_24 [0] : vector<4x128xf32> to vector<128xf32>
    %35 = vector.shape_cast %34 : vector<128xf32> to vector<1x128xf32>
    %c0_25 = arith.constant 0 : index
    %c0_26 = arith.constant 0 : index
    %c0_27 = arith.constant 0 : index
    %36 = vector.load %arg10[%c0_25, %c0_26, %c0_27] : memref<1x1x128xf32, #tpu.memory_space<vmem>>, vector<1x1x128xf32>
    %37 = vector.shape_cast %36 : vector<1x1x128xf32> to vector<1x128xf32>
    %38 = vector.shape_cast %35 : vector<1x128xf32> to vector<1x1x128xf32>
    tpu.vector_store %arg10[%c0_25, %c0_26, %c0_27], %38 {strides = array<i32>} : memref<1x1x128xf32, #tpu.memory_space<vmem>>, vector<1x1x128xf32>,
    %39 = arith.mulf %29, %29 : vector<4x128xf32>
    %cst_28 = arith.constant dense<0.000000e+00> : vector<128xf32>
    %40 = vector.multi_reduction <add>, %39, %cst_28 [0] : vector<4x128xf32> to vector<128xf32>
    %41 = vector.shape_cast %40 : vector<128xf32> to vector<1x128xf32>
    %c0_29 = arith.constant 0 : index
    %c0_30 = arith.constant 0 : index
    %c0_31 = arith.constant 0 : index
    %42 = vector.load %arg11[%c0_29, %c0_30, %c0_31] : memref<1x1x128xf32, #tpu.memory_space<vmem>>, vector<1x1x128xf32>
    %43 = vector.shape_cast %42 : vector<1x1x128xf32> to vector<1x128xf32>
    %44 = vector.shape_cast %41 : vector<1x128xf32> to vector<1x1x128xf32>
    tpu.vector_store %arg11[%c0_29, %c0_30, %c0_31], %44 {strides = array<i32>} : memref<1x1x128xf32, #tpu.memory_space<vmem>>, vector<1x1x128xf32>,
    return
  }
  func.func @transform_0(%arg0: i32) -> (i32, i32, i32) {
    %c0_i32 = arith.constant 0 : i32
    %c0_i32_0 = arith.constant 0 : i32
    %c0_i32_1 = arith.constant 0 : i32
    return %arg0, %c0_i32, %c0_i32_0 : i32, i32, i32
  }
  func.func @transform_1(%arg0: i32) -> (i32, i32) {
    %c0_i32 = arith.constant 0 : i32
    %c0_i32_0 = arith.constant 0 : i32
    %c0_i32_1 = arith.constant 0 : i32
    return %c0_i32, %c0_i32_0 : i32, i32
  }
  func.func @transform_2(%arg0: i32) -> (i32, i32) {
    %c0_i32 = arith.constant 0 : i32
    %c0_i32_0 = arith.constant 0 : i32
    %c0_i32_1 = arith.constant 0 : i32
    return %c0_i32, %c0_i32_0 : i32, i32
  }
  func.func @transform_3(%arg0: i32) -> (i32, i32) {
    %c0_i32 = arith.constant 0 : i32
    %c0_i32_0 = arith.constant 0 : i32
    %c0_i32_1 = arith.constant 0 : i32
    return %c0_i32, %c0_i32_0 : i32, i32
  }
  func.func @transform_4(%arg0: i32) -> (i32, i32) {
    %c0_i32 = arith.constant 0 : i32
    %c0_i32_0 = arith.constant 0 : i32
    %c0_i32_1 = arith.constant 0 : i32
    return %c0_i32, %c0_i32_0 : i32, i32
  }
  func.func @transform_5(%arg0: i32) -> (i32, i32) {
    %c0_i32 = arith.constant 0 : i32
    %c0_i32_0 = arith.constant 0 : i32
    %c0_i32_1 = arith.constant 0 : i32
    return %c0_i32, %c0_i32_0 : i32, i32
  }
  func.func @transform_6(%arg0: i32) -> (i32, i32) {
    %c0_i32 = arith.constant 0 : i32
    %c0_i32_0 = arith.constant 0 : i32
    %c0_i32_1 = arith.constant 0 : i32
    return %c0_i32, %c0_i32_0 : i32, i32
  }
  func.func @transform_7(%arg0: i32) -> (i32, i32) {
    %c0_i32 = arith.constant 0 : i32
    %c0_i32_0 = arith.constant 0 : i32
    %c0_i32_1 = arith.constant 0 : i32
    return %c0_i32, %c0_i32_0 : i32, i32
  }
  func.func @transform_8(%arg0: i32) -> (i32, i32, i32) {
    %c0_i32 = arith.constant 0 : i32
    %c0_i32_0 = arith.constant 0 : i32
    %c0_i32_1 = arith.constant 0 : i32
    return %arg0, %c0_i32, %c0_i32_0 : i32, i32, i32
  }
  func.func @transform_9(%arg0: i32) -> (i32, i32, i32) {
    %c0_i32 = arith.constant 0 : i32
    %c0_i32_0 = arith.constant 0 : i32
    %c0_i32_1 = arith.constant 0 : i32
    return %arg0, %c0_i32, %c0_i32_0 : i32, i32, i32
  }
  func.func @transform_10(%arg0: i32) -> (i32, i32, i32) {
    %c0_i32 = arith.constant 0 : i32
    %c0_i32_0 = arith.constant 0 : i32
    %c0_i32_1 = arith.constant 0 : i32
    return %arg0, %c0_i32, %c0_i32_0 : i32, i32, i32
  }
}

module attributes {stable_mosaic.version = 11 : i64} {
  func.func @finalize_kernel(%arg0: i32, %arg1: memref<1x4x128xbf16, #tpu.memory_space<vmem>>, %arg2: memref<2x1x128xf32, #tpu.memory_space<vmem>>, %arg3: memref<2x1x128xf32, #tpu.memory_space<vmem>>, %arg4: memref<1x128xf32, #tpu.memory_space<vmem>>, %arg5: memref<1x128xf32, #tpu.memory_space<vmem>>, %arg6: memref<1x128xf32, #tpu.memory_space<vmem>>, %arg7: memref<1x1xf32, #tpu.memory_space<vmem>>, %arg8: memref<1x1x1xf32, #tpu.memory_space<vmem>>) attributes {dimension_semantics = [#tpu.dimension_semantics<parallel>], iteration_bounds = array<i64: 2>, scalar_prefetch = 0 : i64, scratch_operands = 0 : i64, tpu.core_type = #tpu.core_type<tc>, window_params = [{transform_indices = @transform_0, window_bounds = array<i64: 1, 4, 128>}, {pipeline_mode = #tpu.pipeline_mode<synchronous>, transform_indices = @transform_1, window_bounds = array<i64: 2, 1, 128>}, {pipeline_mode = #tpu.pipeline_mode<synchronous>, transform_indices = @transform_2, window_bounds = array<i64: 2, 1, 128>}, {pipeline_mode = #tpu.pipeline_mode<synchronous>, transform_indices = @transform_3, window_bounds = array<i64: 1, 128>}, {pipeline_mode = #tpu.pipeline_mode<synchronous>, transform_indices = @transform_4, window_bounds = array<i64: 1, 128>}, {pipeline_mode = #tpu.pipeline_mode<synchronous>, transform_indices = @transform_5, window_bounds = array<i64: 1, 128>}, {pipeline_mode = #tpu.pipeline_mode<synchronous>, transform_indices = @transform_6, window_bounds = array<i64: 1, 1>}, {transform_indices = @transform_7, window_bounds = array<i64: 1, 1, 1>}]} {
    %c0 = arith.constant 0 : index
    %c0_0 = arith.constant 0 : index
    %c0_1 = arith.constant 0 : index
    %0 = vector.load %arg2[%c0, %c0_0, %c0_1] : memref<2x1x128xf32, #tpu.memory_space<vmem>>, vector<2x1x128xf32>
    %cst = arith.constant dense<0.000000e+00> : vector<1x128xf32>
    %1 = vector.multi_reduction <add>, %0, %cst [0] : vector<2x1x128xf32> to vector<1x128xf32>
    %cst_2 = arith.constant 1.250000e-01 : f32
    %2 = vector.broadcast %cst_2 : f32 to vector<1x128xf32>
    %3 = arith.mulf %1, %2 : vector<1x128xf32>
    %c0_3 = arith.constant 0 : index
    %c0_4 = arith.constant 0 : index
    %c0_5 = arith.constant 0 : index
    %4 = vector.load %arg3[%c0_3, %c0_4, %c0_5] : memref<2x1x128xf32, #tpu.memory_space<vmem>>, vector<2x1x128xf32>
    %cst_6 = arith.constant dense<0.000000e+00> : vector<1x128xf32>
    %5 = vector.multi_reduction <add>, %4, %cst_6 [0] : vector<2x1x128xf32> to vector<1x128xf32>
    %cst_7 = arith.constant 1.250000e-01 : f32
    %6 = vector.broadcast %cst_7 : f32 to vector<1x128xf32>
    %7 = arith.mulf %5, %6 : vector<1x128xf32>
    %8 = arith.mulf %3, %3 : vector<1x128xf32>
    %9 = arith.subf %7, %8 : vector<1x128xf32>
    %cst_8 = arith.constant 0.000000e+00 : f32
    %10 = vector.broadcast %cst_8 : f32 to vector<1x128xf32>
    %11 = arith.maximumf %9, %10 : vector<1x128xf32>
    %c0_9 = arith.constant 0 : index
    %c0_10 = arith.constant 0 : index
    %12 = vector.load %arg4[%c0_9, %c0_10] : memref<1x128xf32, #tpu.memory_space<vmem>>, vector<1x128xf32>
    %cst_11 = arith.constant 9.99999974E-6 : f32
    %13 = vector.broadcast %cst_11 : f32 to vector<1x128xf32>
    %14 = arith.addf %11, %13 : vector<1x128xf32>
    %15 = math.rsqrt %14 : vector<1x128xf32>
    %16 = arith.mulf %12, %15 : vector<1x128xf32>
    %c0_12 = arith.constant 0 : index
    %c0_13 = arith.constant 0 : index
    %17 = vector.load %arg5[%c0_12, %c0_13] : memref<1x128xf32, #tpu.memory_space<vmem>>, vector<1x128xf32>
    %18 = arith.mulf %3, %16 : vector<1x128xf32>
    %19 = arith.subf %17, %18 : vector<1x128xf32>
    %c0_14 = arith.constant 0 : index
    %c0_15 = arith.constant 0 : index
    %20 = vector.load %arg6[%c0_14, %c0_15] : memref<1x128xf32, #tpu.memory_space<vmem>>, vector<1x128xf32>
    %c0_16 = arith.constant 0 : index
    %c0_17 = arith.constant 0 : index
    %21 = vector.load %arg7[%c0_16, %c0_17] : memref<1x1xf32, #tpu.memory_space<vmem>>, vector<1x1xf32>
    %c0_18 = arith.constant 0 : index
    %c0_19 = arith.constant 0 : index
    %c0_20 = arith.constant 0 : index
    %22 = vector.load %arg1[%c0_18, %c0_19, %c0_20] : memref<1x4x128xbf16, #tpu.memory_space<vmem>>, vector<1x4x128xbf16>
    %23 = vector.shape_cast %22 : vector<1x4x128xbf16> to vector<4x128xbf16>
    %24 = arith.extf %23 : vector<4x128xbf16> to vector<4x128xf32>
    %25 = vector.broadcast %16 : vector<1x128xf32> to vector<4x128xf32>
    %26 = arith.mulf %24, %25 : vector<4x128xf32>
    %27 = vector.broadcast %19 : vector<1x128xf32> to vector<4x128xf32>
    %28 = arith.addf %26, %27 : vector<4x128xf32>
    %cst_21 = arith.constant 0.000000e+00 : f32
    %29 = vector.broadcast %cst_21 : f32 to vector<4x128xf32>
    %30 = arith.cmpf ogt, %28, %29 : vector<4x128xf32>
    %cst_22 = arith.constant 2.000000e-01 : f32
    %31 = vector.broadcast %cst_22 : f32 to vector<4x128xf32>
    %32 = arith.mulf %31, %28 : vector<4x128xf32>
    %33 = arith.select %30, %28, %32 : vector<4x128xi1>, vector<4x128xf32>
    %cst_23 = arith.constant dense<0.000000e+00> : vector<128xf32>
    %34 = vector.multi_reduction <add>, %33, %cst_23 [0] : vector<4x128xf32> to vector<128xf32>
    %35 = vector.shape_cast %34 : vector<128xf32> to vector<1x128xf32>
    %cst_24 = arith.constant 4.000000e+00 : f32
    %36 = vector.broadcast %cst_24 : f32 to vector<1x128xf32>
    %37 = arith.divf %35, %36 : vector<1x128xf32>
    %38 = arith.mulf %37, %20 : vector<1x128xf32>
    %cst_25 = arith.constant dense<0.000000e+00> : vector<1xf32>
    %39 = vector.multi_reduction <add>, %38, %cst_25 [1] : vector<1x128xf32> to vector<1xf32>
    %40 = vector.shape_cast %39 : vector<1xf32> to vector<1x1xf32>
    %41 = arith.addf %40, %21 : vector<1x1xf32>
    %42 = arith.negf %41 : vector<1x1xf32>
    %43 = math.exp %42 : vector<1x1xf32>
    %cst_26 = arith.constant 1.000000e+00 : f32
    %44 = vector.broadcast %cst_26 : f32 to vector<1x1xf32>
    %45 = arith.addf %44, %43 : vector<1x1xf32>
    %46 = arith.divf %44, %45 : vector<1x1xf32>
    %c0_27 = arith.constant 0 : index
    %c0_28 = arith.constant 0 : index
    %c0_29 = arith.constant 0 : index
    %47 = vector.load %arg8[%c0_27, %c0_28, %c0_29] : memref<1x1x1xf32, #tpu.memory_space<vmem>>, vector<1x1x1xf32>
    %48 = vector.shape_cast %47 : vector<1x1x1xf32> to vector<1x1xf32>
    %49 = vector.shape_cast %46 : vector<1x1xf32> to vector<1x1x1xf32>
    tpu.vector_store %arg8[%c0_27, %c0_28, %c0_29], %49 {strides = array<i32>} : memref<1x1x1xf32, #tpu.memory_space<vmem>>, vector<1x1x1xf32>,
    return
  }
  func.func @transform_0(%arg0: i32) -> (i32, i32, i32) {
    %c0_i32 = arith.constant 0 : i32
    %c0_i32_0 = arith.constant 0 : i32
    %c0_i32_1 = arith.constant 0 : i32
    return %arg0, %c0_i32, %c0_i32_0 : i32, i32, i32
  }
  func.func @transform_1(%arg0: i32) -> (i32, i32, i32) {
    %c0_i32 = arith.constant 0 : i32
    %c0_i32_0 = arith.constant 0 : i32
    %c0_i32_1 = arith.constant 0 : i32
    %c0_i32_2 = arith.constant 0 : i32
    return %c0_i32, %c0_i32_0, %c0_i32_1 : i32, i32, i32
  }
  func.func @transform_2(%arg0: i32) -> (i32, i32, i32) {
    %c0_i32 = arith.constant 0 : i32
    %c0_i32_0 = arith.constant 0 : i32
    %c0_i32_1 = arith.constant 0 : i32
    %c0_i32_2 = arith.constant 0 : i32
    return %c0_i32, %c0_i32_0, %c0_i32_1 : i32, i32, i32
  }
  func.func @transform_3(%arg0: i32) -> (i32, i32) {
    %c0_i32 = arith.constant 0 : i32
    %c0_i32_0 = arith.constant 0 : i32
    %c0_i32_1 = arith.constant 0 : i32
    return %c0_i32, %c0_i32_0 : i32, i32
  }
  func.func @transform_4(%arg0: i32) -> (i32, i32) {
    %c0_i32 = arith.constant 0 : i32
    %c0_i32_0 = arith.constant 0 : i32
    %c0_i32_1 = arith.constant 0 : i32
    return %c0_i32, %c0_i32_0 : i32, i32
  }
  func.func @transform_5(%arg0: i32) -> (i32, i32) {
    %c0_i32 = arith.constant 0 : i32
    %c0_i32_0 = arith.constant 0 : i32
    %c0_i32_1 = arith.constant 0 : i32
    return %c0_i32, %c0_i32_0 : i32, i32
  }
  func.func @transform_6(%arg0: i32) -> (i32, i32) {
    %c0_i32 = arith.constant 0 : i32
    %c0_i32_0 = arith.constant 0 : i32
    %c0_i32_1 = arith.constant 0 : i32
    return %c0_i32, %c0_i32_0 : i32, i32
  }
  func.func @transform_7(%arg0: i32) -> (i32, i32, i32) {
    %c0_i32 = arith.constant 0 : i32
    %c0_i32_0 = arith.constant 0 : i32
    %c0_i32_1 = arith.constant 0 : i32
    return %arg0, %c0_i32, %c0_i32_0 : i32, i32, i32
  }
}

</mosaic_0001>

<bundles_post_ra>
// kernel: discriminator_forward.3
= control target key start
LH: loop header
LB: loop body
LE: loop exit
PB: predicated region body
PF: predicated region fallthrough
CT: control target
= control target key end

     0   :  { %s462_s26 = smov 0   ;;  %s509_s0 = inlined_call_operand.vmem [shape: bf16[2,4,128], index: 0, kind: input, shape index: {}]   ;;  %s510_s1 = inlined_call_operand.vmem [shape: f32[2,1,128], index: 1, kind: input, shape index: {}]   ;;  %s511_s2 = inlined_call_operand.vmem [shape: f32[2,1,128], index: 2, kind: input, shape index: {}]   ;;  %s512_s3 = inlined_call_operand.vmem [shape: f32[1,128], index: 3, kind: input, shape index: {}]   ;;  %s513_s4 = inlined_call_operand.vmem [shape: f32[1,128], index: 4, kind: input, shape index: {}]   ;;  %s514_s5 = inlined_call_operand.vmem [shape: f32[1,128], index: 5, kind: input, shape index: {}]   ;;  %s515_s6 = inlined_call_operand.<no memory space> [shape: f32[1,1], index: 6, kind: input, shape index: {}]   ;;  %s516_s7 = inlined_call_operand.vmem [shape: f32[2,1,1], index: 7, kind: output, shape index: {}]  }
   0x1   :  { %v12_v0 = vstv %s515_s6 }
   0x2   :  { %13 = vst [vmem:[#allocation2] sm:$0x1] %v12_v0 }
   0x3 LB: > { %s388_s27 = sadd.s32 4294967295, %s417_s26   ;;  %p392_p0 = scmp.ge.s32.totalorder %s417_s26, 1  ;;  %s417_s26 = sphi %s462_s26, %s19_s26  }
   0x4   : > { %p238_p1 = scmp.lt.s32.totalorder %s417_s26, 3 }
   0x6   : > { %p239_p2 = pnand %p392_p0, %p238_p1 }
   0x7   : > { %v274_v1 = vld [vmem:[%s510_s1] sm:$0x1] (!%p239_p2)  ;;  %v275_v2 = vld [vmem:[%s510_s1 + $0x1] sm:$0x1] (!%p239_p2)  ;;  %vm276_vm0 = vcmask (!%p239_p2), 1040384   ;;  %p267_p3 = scmp.lt.s32.totalorder (!%p239_p2), %s388_s27, 1  ;;  %v302_v17 = vlaneseq (!%p239_p2) }
   0x8   : > { %242 = sbr.rel (%p239_p2) target bundleno = 234 (0xea), region = 48  ;;  %v277_v3 = vsel (!%p239_p2), %vm276_vm0, %v274_v1, 0.0  ;;  %v278_v4 = vsel (!%p239_p2), %vm276_vm0, %v275_v2, 0.0  ;;  %v281_v5 = vld [vmem:[%s511_s2] sm:$0x1] (!%p239_p2)  ;;  %vm318_vm2 = vcmask (!%p239_p2), 1043456  }
   0x9   : > { %v282_v6 = vld [vmem:[%s511_s2 + $0x1] sm:$0x1] (!%p239_p2)  ;;  %v279_v7 = vadd.f32 (!%p239_p2), %v278_v4, %v277_v3  ;;  %v283_v8 = vsel (!%p239_p2), %vm276_vm0, %v281_v5, 0.0  ;;  %v303_v18 = vshrl.u32 (!%p239_p2), %v302_v17, 7  ;;  %v290_v19 = vld [vmem:[%s512_s3] sm:$0x1] (!%p239_p2) }
   0xa   : > { %v284_v9 = vsel (!%p239_p2), %vm276_vm0, %v282_v6, 0.0  ;;  %v294_v25 = vld [vmem:[%s513_s4] sm:$0x1] (!%p239_p2)  ;;  %vm339_vm3 = vcmask (!%p239_p2), 0  }
   0xb   : > { %v285_v10 = vadd.f32 (!%p239_p2), %v284_v9, %v283_v8  ;;  %v280_v11 = vmul.f32 (!%p239_p2), 0.125, %v279_v7  ;;  %v304_v21 = vsub.s32 (!%p239_p2), 0, %v303_v18  ;;  %v297_v41 = vld [vmem:[%s514_s5] sm:$0x1] (!%p239_p2) }
   0xc   : > { %v298_v45 = vld [vmem:[#allocation2] sm:$0x1] (!%p239_p2) }
   0xd   : > { %v286_v12 = vmul.f32 (!%p239_p2), 0.125, %v285_v10  ;;  %v287_v13 = vmul.f32 (!%p239_p2), %v280_v11, %v280_v11 }
   0xf   : > { %v288_v14 = vsub.f32 %v286_v12, %v287_v13  ;;  %s518_s27 = smov (!%p267_p3, %s388_s27), 1 }
  0x10   : > { %s393_s12 = sshll.u32 %s518_s27, 1  ;;  %s273_s24 = scalar_lea.vmem %s516_s7, %s518_s27 }
  0x11   : > { %v289_v15 = vmax.f32 %v288_v14, 0.0  ;;  %s270_s15 = scalar_lea.vmem %s509_s0, %s393_s12 }
  0x12   : > { %v299_v20 = vld [vmem:[%s270_s15] sm:$0x3] }
  0x13   : > { %v291_v16 = vadd.f32 1e-05, %v289_v15  ;;  %v300_v24 = vunpack.c.l.bf16 %v299_v20 }
  0x15   : > { %405 = vrsqrt.f32 %v291_v16 }
  0x1f   : > { %v406_v22 = vpop.eup %405 }
  0x20   : > { %v293_v23 = vmul.f32 %v406_v22, %v290_v19 }
  0x22   : > { %v295_v26 = vmul.f32 %v293_v23, %v280_v11  ;;  %v305_v27 = vrot.slane %v293_v23, %v304_v21 }
  0x24   : > { %v296_v28 = vsub.f32 %v294_v25, %v295_v26  ;;  %v307_v29 = vmul.f32 %v305_v27, %v300_v24 }
  0x26   : > { %v312_v30 = vrot.slane %v296_v28, %v304_v21 }
  0x28   : > { %v314_v31 = vadd.f32 %v312_v30, %v307_v29 }
  0x2a   : > { %vm315_vm1 = vcmp.gt.f32.partialorder %v314_v31, 0.0  ;;  %v316_v32 = vmul.f32 0.2, %v314_v31 }
  0x2c   : > { %v317_v33 = vsel %vm315_vm1, %v314_v31, %v316_v32 }
  0x2d   : > { %v319_v34 = vsel %vm318_vm2, %v317_v33, 0.0 }
  0x2e   : > { %v320_v35 = vrot.slane %v319_v34, 4 }
  0x30   : > { %v321_v36 = vadd.f32 %v320_v35, %v319_v34 }
  0x32   : > { %v322_v37 = vrot.slane %v321_v36, 2 }
  0x34   : > { %v323_v38 = vadd.f32 %v322_v37, %v321_v36 }
  0x36   : > { %v324_v39 = vrot.slane %v323_v38, 1 }
  0x38   : > { %v325_v40 = vadd.f32 %v324_v39, %v323_v38 }
  0x3a   : > { %v327_v42 = vmul.f32 0.25, %v325_v40 }
  0x3c   : > { %v328_v43 = vmul.f32 %v327_v42, %v297_v41 }
  0x3e   : > { %v329_v44 = vsel %vm276_vm0, %v328_v43, 0.0 }
  0x3f   : > { %330 = vadd.xlane.f32.xlu0 %v329_v44 }
  0xcc   : > { %v331_v46 = vpop.xlane.xlu0 %330 }
  0xcd   : > { %v332_v47 = vadd.f32 %v331_v46, %v298_v45 }
  0xcf   : > { %v394_v48 = vmul.f32 -1.442695, %v332_v47 }
  0xd1   : > { %407 = vpow2.f32 %v394_v48 }
  0xdb   : > { %v408_v49 = vpop.eup %407 }
  0xdc   : > { %v336_v50 = vadd.f32 1.0, %v408_v49 }
  0xde   : > { %409 = vrcp.f32 %v336_v50 }
  0xe8   : > { %v410_v51 = vpop.eup %409 }
  0xe9   : > { %340 = vst.msk [vmem:[%s273_s24] sm:$0x1] %vm339_vm3, %v410_v51 }
  0xea PF: > { %s19_s26 = sadd.s32 1, %s417_s26  }
  0xeb   : > { %p16_p4 = scmp.ge.s32.totalorder %s19_s26, 4  }
  0xed   :  { %18 = sbr.rel (!%p16_p4) target bundleno = 3 (0x3), region = 78 }

// kernel: discriminator_forward.2
= control target key start
LH: loop header
LB: loop body
LE: loop exit
PB: predicated region body
PF: predicated region fallthrough
CT: control target
= control target key end

     0   :  { %s1033_s13 = smov 0   ;;  %s1151_s0 = inlined_call_operand.vmem [shape: bf16[2,6,16], index: 0, kind: input, shape index: {}]   ;;  %s1152_s1 = inlined_call_operand.vmem [shape: bf16[16,128], index: 1, kind: input, shape index: {}]   ;;  %s1153_s2 = inlined_call_operand.vmem [shape: bf16[16,128], index: 2, kind: input, shape index: {}]   ;;  %s1154_s3 = inlined_call_operand.vmem [shape: f32[1,128], index: 3, kind: input, shape index: {}]   ;;  %s1155_s4 = inlined_call_operand.vmem [shape: f32[5,128], index: 4, kind: input, shape index: {}]   ;;  %s1156_s5 = inlined_call_operand.vmem [shape: bf16[128,128], index: 5, kind: input, shape index: {}]   ;;  %s1157_s6 = inlined_call_operand.vmem [shape: bf16[128,128], index: 6, kind: input, shape index: {}]   ;;  %s1158_s7 = inlined_call_operand.vmem [shape: f32[1,128], index: 7, kind: input, shape index: {}]   ;;  %s1159_s8 = inlined_call_operand.vmem [shape: bf16[2,4,128], index: 8, kind: output, shape index: {0}]   ;;  %s1160_s9 = inlined_call_operand.vmem [shape: f32[2,1,128], index: 9, kind: output, shape index: {1}]   ;;  %s1161_s10 = inlined_call_operand.vmem [shape: f32[2,1,128], index: 10, kind: output, shape index: {2}]  }
   0x1 LB: > { %s835_s14 = sadd.s32 4294967295, %s974_s13   ;;  %p839_p0 = scmp.ge.s32.totalorder %s974_s13, 1  ;;  %s974_s13 = sphi %s1033_s13, %s21_s13  }
   0x2   : > { %p316_p1 = scmp.lt.s32.totalorder %s974_s13, 3 }
   0x4   : > { %p317_p2 = pnand %p839_p0, %p316_p1 }
   0x5   : > { %v950_v0 = vld [vmem:[%s1152_s1] sm:$0xff] (!%p317_p2)   ;;  %v976_v1 = vmov (!%p317_p2), 0.0   ;;  %vm977_vm0 = vmmov (!%p317_p2), 0   ;;  %p358_p3 = scmp.lt.s32.totalorder (!%p317_p2), %s835_s14, 1  ;;  %vm419_vm1 = vcmask (!%p317_p2), 130048   ;;  %v954_v6 = vld [vmem:[%s1156_s5 + $0x8] sm:$0xff] (!%p317_p2)  }
   0x6   : > { %320 = sbr.rel (%p317_p2) target bundleno = 476 (0x1dc), region = 52  ;;  %888 = vmatprep.subr.bf16.mxu0 (!%p317_p2), %v976_v1  ;;  %894 = vmatprep.subr.bf16.mxu1 (!%p317_p2), %v976_v1  ;;  %v951_v2 = vld [vmem:[%s1153_s2] sm:$0xff] (!%p317_p2)   ;;  %v955_v7 = vld [vmem:[%s1157_s6 + $0x8] sm:$0xff] (!%p317_p2)   ;;  %v956_v8 = vld [vmem:[%s1156_s5 + $0x10] sm:$0xff] (!%p317_p2)   ;;  %vm714_vm3 = vcmask (!%p317_p2), 1043456  }
   0x7   : > { %889 = vmatpush3.bf16.msra.mxu0 (!%p317_p2), %v950_v0  ;;  %890 = vmatprep.mubr.msk.bf16.mxu0 (!%p317_p2), %vm977_vm0, %v976_v1  ;;  %v952_v3 = vld [vmem:[%s1156_s5] sm:$0xff] (!%p317_p2)   ;;  %v957_v9 = vld [vmem:[%s1157_s6 + $0x10] sm:$0xff] (!%p317_p2)   ;;  %v958_v10 = vld [vmem:[%s1156_s5 + $0x18] sm:$0xff] (!%p317_p2)  }
   0x8   : > { %895 = vmatpush3.bf16.msra.mxu1 (!%p317_p2), %v951_v2  ;;  %896 = vmatprep.mubr.msk.bf16.mxu1 (!%p317_p2), %vm977_vm0, %v976_v1  ;;  %v953_v4 = vld [vmem:[%s1157_s6] sm:$0xff] (!%p317_p2)   ;;  %v959_v11 = vld [vmem:[%s1157_s6 + $0x18] sm:$0xff] (!%p317_p2)   ;;  %v962_v14 = vld [vmem:[%s1156_s5 + $0x28] sm:$0xff] (!%p317_p2)  }
   0x9   : > { %900 = vmatprep.subr.bf16.mxu0 (!%p317_p2), %v976_v1  ;;  %920 = vmatprep.subr.bf16.mxu1 (!%p317_p2), %v976_v1  ;;  %v960_v12 = vld [vmem:[%s1156_s5 + $0x20] sm:$0xff] (!%p317_p2)   ;;  %v963_v15 = vld [vmem:[%s1157_s6 + $0x28] sm:$0xff] (!%p317_p2)   ;;  %v964_v16 = vld [vmem:[%s1156_s5 + $0x30] sm:$0xff] (!%p317_p2)  }
   0xa   : > { %v961_v13 = vld [vmem:[%s1157_s6 + $0x20] sm:$0xff] (!%p317_p2)   ;;  %v965_v17 = vld [vmem:[%s1157_s6 + $0x30] sm:$0xff] (!%p317_p2)   ;;  %v966_v18 = vld [vmem:[%s1156_s5 + $0x38] sm:$0xff] (!%p317_p2)  }
   0xb   : > { %v967_v19 = vld [vmem:[%s1157_s6 + $0x38] sm:$0xff] (!%p317_p2)   ;;  %v846_v25 = vld [vmem:[%s1154_s3] ss:$0 sm:$0xff] (!%p317_p2) }
   0xc   : > { %v378_v33 = vld [vmem:[%s1155_s4] sm:$0x1f] (!%p317_p2) }
   0xd   : > { %s1163_s14 = smov (!%p358_p3, %s835_s14), 1  ;;  %v863_v42 = vld [vmem:[%s1158_s7] ss:$0 sm:$0xff] }
   0xe   : > { %s840_s21 = sshll.u32 %s1163_s14, 2  ;;  %s841_s25 = sshll.u32 %s1163_s14, 1 }
   0xf   : > { %s361_s26 = scalar_lea.vmem %s1151_s0, %s840_s21  ;;  %s365_s28 = scalar_lea.vmem %s1159_s8, %s841_s25 }
  0x10   : > { %v412_v5 = vld [vmem:[%s361_s26] sm:$0x7]  ;;  %s368_s11 = scalar_lea.vmem %s1160_s9, %s1163_s14  ;;  %s371_s16 = scalar_lea.vmem %s1161_s10, %s1163_s14 }
  0x11   : > { %891 = vmatmul.mubr.msk.bf16.vlgmr.msra.gmra.mrb[0].mxu0 %vm419_vm1, %v412_v5  ;;  %897 = vmatmul.mubr.msk.bf16.vlgmr.msra.gmra.mrb[0].mxu1 %vm419_vm1, %v412_v5 }
  0x12   : > { %901 = vmatpush3.bf16.msra.mxu0 %v952_v3  ;;  %921 = vmatpush3.bf16.msra.mxu1 %v953_v4 }
  0x13   : > { %902 = vmatprep.subr.bf16.mxu0 %v976_v1  ;;  %922 = vmatprep.subr.bf16.mxu1 %v976_v1 }
  0x14   : > { %916 = vmatprep.mubr.msk.bf16.mxu0 %vm977_vm0, %v976_v1  ;;  %936 = vmatprep.mubr.msk.bf16.mxu1 %vm977_vm0, %v976_v1 }
  0x16   : > { %903 = vmatpush3.bf16.msra.mxu0 %v954_v6  ;;  %923 = vmatpush3.bf16.msra.mxu1 %v955_v7 }
  0x17   : > { %904 = vmatprep.subr.bf16.mxu0 %v976_v1  ;;  %924 = vmatprep.subr.bf16.mxu1 %v976_v1 }
  0x1a   : > { %905 = vmatpush3.bf16.msra.mxu0 %v956_v8  ;;  %925 = vmatpush3.bf16.msra.mxu1 %v957_v9 }
  0x1b   : > { %906 = vmatprep.subr.bf16.mxu0 %v976_v1  ;;  %926 = vmatprep.subr.bf16.mxu1 %v976_v1 }
  0x1e   : > { %907 = vmatpush3.bf16.msra.mxu0 %v958_v10  ;;  %927 = vmatpush3.bf16.msra.mxu1 %v959_v11 }
  0x1f   : > { %908 = vmatprep.subr.bf16.mxu0 %v976_v1  ;;  %928 = vmatprep.subr.bf16.mxu1 %v976_v1 }
  0x22   : > { %909 = vmatpush3.bf16.msra.mxu0 %v960_v12  ;;  %929 = vmatpush3.bf16.msra.mxu1 %v961_v13 }
  0x23   : > { %910 = vmatprep.subr.bf16.mxu0 %v976_v1  ;;  %930 = vmatprep.subr.bf16.mxu1 %v976_v1 }
  0x26   : > { %911 = vmatpush3.bf16.msra.mxu0 %v962_v14  ;;  %931 = vmatpush3.bf16.msra.mxu1 %v963_v15 }
  0x27   : > { %912 = vmatprep.subr.bf16.mxu0 %v976_v1  ;;  %932 = vmatprep.subr.bf16.mxu1 %v976_v1 }
  0x2a   : > { %913 = vmatpush3.bf16.msra.mxu0 %v964_v16  ;;  %933 = vmatpush3.bf16.msra.mxu1 %v965_v17 }
  0x2b   : > { %914 = vmatprep.subr.bf16.mxu0 %v976_v1  ;;  %934 = vmatprep.subr.bf16.mxu1 %v976_v1 }
  0x2e   : > { %915 = vmatpush3.bf16.msra.mxu0 %v966_v18  ;;  %935 = vmatpush3.bf16.msra.mxu1 %v967_v19 }
  0xe4   : > { %v457_v20 = vpop.f32.mrb[0].mxu0  ;;  %v503_v21 = vpop.f32.mrb[0].mxu1 }
  0xe5   : > { %v510_v22 = vrot.slane %v503_v21, 1  ;;  %v892_v23 = vpop.f32.mrb[1].mxu0  ;;  %v898_v24 = vpop.f32.mrb[1].mxu1 }
  0xe6   : > { %v460_v26 = vpop.f32.mrb[2].mxu0  ;;  %v506_v27 = vpop.f32.mrb[2].mxu1 }
  0xe7   : > { %v512_v28 = vadd.f32 %v510_v22, %v457_v20  ;;  %v893_v29 = vpop.f32.mrb[3].mxu0  ;;  %v899_v30 = vpop.f32.mrb[3].mxu1 }
  0xe9   : > { %v519_v31 = vadd.f32 %v846_v25, %v512_v28 }
  0xeb   : > { %vm520_vm2 = vcmp.gt.f32.partialorder %v519_v31, 0.0  ;;  %v521_v32 = vmul.f32 0.2, %v519_v31 }
  0xed   : > { %v522_v34 = vsel %vm520_vm2, %v519_v31, %v521_v32 }
  0xee   : > { %v523_v35 = vmul.f32 %v522_v34, %v378_v33 }
  0xf0   : > { %v524_v36 = vpack.c.bf16 %v523_v35, %v523_v35 }
  0xf2   : > { %917 = vmatmul.mubr.bf16.vlgmr.msra.gmra.mrb[4].mxu0 %v524_v36  ;;  %937 = vmatmul.mubr.bf16.vlgmr.msra.gmra.mrb[4].mxu1 %v524_v36 }
 0x1c5   : > { %v607_v37 = vpop.f32.mrb[4].mxu0  ;;  %v695_v38 = vpop.f32.mrb[4].mxu1 }
 0x1c6   : > { %v702_v39 = vrot.slane %v695_v38, 1  ;;  %v918_v40 = vpop.f32.mrb[5].mxu0  ;;  %v938_v41 = vpop.f32.mrb[5].mxu1 }
 0x1c7   : > { %v610_v43 = vpop.f32.mrb[6].mxu0  ;;  %v698_v44 = vpop.f32.mrb[6].mxu1 }
 0x1c8   : > { %v704_v45 = vadd.f32 %v702_v39, %v607_v37  ;;  %v919_v46 = vpop.f32.mrb[7].mxu0  ;;  %v939_v47 = vpop.f32.mrb[7].mxu1 }
 0x1ca   : > { %v711_v48 = vadd.f32 %v863_v42, %v704_v45 }
 0x1cc   : > { %v712_v49 = vpack.c.bf16 %v711_v48, %v711_v48  ;;  %v715_v50 = vsel %vm714_vm3, %v711_v48, 0.0  ;;  %v723_v51 = vmul.f32 %v711_v48, %v711_v48 }
 0x1cd   : > { %v716_v52 = vrot.slane %v715_v50, 4 }
 0x1ce   : > { %713 = vst [vmem:[%s365_s28] sm:$0x3] %v712_v49  ;;  %v724_v53 = vsel %vm714_vm3, %v723_v51, 0.0 }
 0x1cf   : > { %v717_v54 = vadd.f32 %v716_v52, %v715_v50  ;;  %v725_v55 = vrot.slane %v724_v53, 4 }
 0x1d1   : > { %v718_v56 = vrot.slane %v717_v54, 2  ;;  %v726_v57 = vadd.f32 %v725_v55, %v724_v53 }
 0x1d3   : > { %v719_v58 = vadd.f32 %v718_v56, %v717_v54  ;;  %v727_v59 = vrot.slane %v726_v57, 2 }
 0x1d5   : > { %v720_v60 = vrot.slane %v719_v58, 1  ;;  %v728_v61 = vadd.f32 %v727_v59, %v726_v57 }
 0x1d7   : > { %v721_v62 = vadd.f32 %v720_v60, %v719_v58  ;;  %v729_v63 = vrot.slane %v728_v61, 1 }
 0x1d9   : > { %722 = vst [vmem:[%s368_s11] sm:$0x1] %v721_v62  ;;  %v730_v0 = vadd.f32 %v729_v63, %v728_v61 }
 0x1db   : > { %731 = vst [vmem:[%s371_s16] sm:$0x1] %v730_v0 }
 0x1dc PF: > { %s21_s13 = sadd.s32 1, %s974_s13  }
 0x1dd   : > { %p18_p4 = scmp.ge.s32.totalorder %s21_s13, 4  }
 0x1df   :  { %20 = sbr.rel (!%p18_p4) target bundleno = 1 (0x1), region = 106 }

</bundles_post_ra>
